<compile_context>
chip_gen: v7x
topology: tpu7x:2x2x1
jax: 0.10.0
libtpu: 0.0.40
codegen_flags: <defaults>
</compile_context>

<pallas_src>
import functools

import jax
import jax.numpy as jnp
from jax import lax
from jax.experimental import pallas as pl
from jax.experimental.pallas import tpu as pltpu


def _round_up(x, m):
    return (x + m - 1) // m * m


def _textcnn_pool_kernel(b_tile, seq_len, cb, x_ref, w_ref, mask_ref, b_ref,
                         out_ref):
    """Pooled conv features for one batch tile.

    x_ref:    (b_tile*L, K) bf16   im2col'd embeddings (K = max_fs * E)
    w_ref:    (K, CPAD)     bf16   flattened packed conv weights
    mask_ref: (L, CPAD)     f32    additive validity mask (0 / -1e30)
    b_ref:    (1, CPAD)     f32    packed conv bias
    out_ref:  (b_tile, CPAD) f32   relu(maxpool(conv)) features
    """
    cpad = out_ref.shape[-1]
    w = w_ref[...]
    mask = mask_ref[...]
    bias = b_ref[...]
    rows_c = cb * seq_len
    n_chunks = b_tile // cb

    def compute_chunk(xs):
        # One MXU matmul with the full contraction K = max_fs * E.
        y = jnp.dot(xs, w, preferred_element_type=jnp.float32)   # (rows_c, CPAD)
        y = y.reshape(cb, seq_len, cpad) + mask[None, :, :]      # additive mask
        # Bias + ReLU deferred past the max-pool.
        return jnp.maximum(jnp.max(y, axis=1) + bias, 0.0)       # (cb, CPAD)

    if n_chunks == 1:
        out_ref[...] = compute_chunk(x_ref[...])
    else:
        def body(c, carry):
            r0 = pl.multiple_of(c * rows_c, rows_c)
            o0 = pl.multiple_of(c * cb, cb)
            out_ref[pl.ds(o0, cb), :] = compute_chunk(
                x_ref[pl.ds(r0, rows_c), :])
            return carry

        lax.fori_loop(0, n_chunks, body, 0, unroll=(n_chunks <= 4))


def textcnn_forward(token_ids, embed_table, conv_weights, conv_biases,
                    lin_weight, lin_bias, filter_sizes, *, b_tile=128,
                    interpret=False):
    """TextCNN forward (inference; Dropout(p=0.7) is identity in eval mode).

    token_ids:    (B, L) int32
    embed_table:  (V, E) f32
    conv_weights: list of (C, E, fs) f32   -- PyTorch Conv1d layout
    conv_biases:  list of (C,) f32
    lin_weight:   (2, n*C) f32             -- PyTorch Linear layout
    lin_bias:     (2,) f32
    """
    B, L = token_ids.shape
    _, E = embed_table.shape
    C = conv_weights[0].shape[0]
    n = len(filter_sizes)
    cn = n * C
    max_fs = max(filter_sizes)
    assert L >= max_fs, (
        "sequence length must be >= max filter size (PyTorch Conv1d would "
        "raise for L < kernel_size)")
    K = max_fs * E                           # fused contraction dim (128 here)
    cpad = _round_up(max(cn, 128), 128)      # lane-dense feature width

    # ---- one-time weight / bias / mask packing (plain JAX, cheap) ---------
    w_flat = jnp.zeros((K, cpad), jnp.float32)         # (max_fs*E, CPAD)
    b_packed = jnp.zeros((1, cpad), jnp.float32)
    mask = jnp.zeros((L, cpad), jnp.float32)           # additive 0 / -1e30
    pos = jnp.arange(L)[:, None]
    for i, (fs, w, b) in enumerate(zip(filter_sizes, conv_weights, conv_biases)):
        for k in range(fs):
            w_flat = w_flat.at[k * E:(k + 1) * E, i * C:(i + 1) * C].set(
                w[:, :, k].T)                           # (E, C)
        b_packed = b_packed.at[0, i * C:(i + 1) * C].set(b)
        mask = mask.at[:, i * C:(i + 1) * C].set(
            jnp.where(pos < (L - fs + 1), 0.0, -1e30))
    w_flat = w_flat.astype(jnp.bfloat16)

    # ---- embedding gather + per-batch im2col (XLA glue) -------------------
    x = jnp.take(embed_table, token_ids, axis=0).astype(jnp.bfloat16)  # (B,L,E)
    shifted = [x]
    for k in range(1, max_fs):
        shifted.append(jnp.pad(x[:, k:, :], ((0, 0), (0, k), (0, 0))))
    x_im = jnp.concatenate(shifted, axis=-1)            # (B, L, K)

    # ---- batch tiling ------------------------------------------------------
    # Sizable tiles, but keep the grid >= 2 steps (megacore) when the batch
    # allows, and keep the double-buffered tile budget well under v7x's
    # 64 MiB VMEM.
    b_tile = max(8, (b_tile // 8) * 8)
    b_ceil = _round_up(B, 8)
    if b_ceil >= 16:
        b_tile = min(b_tile, _round_up(b_ceil // 2, 8))
    else:
        b_tile = min(b_tile, b_ceil)

    # Chunk size inside a tile: bounds the live (chunk_rows, CPAD) f32
    # intermediate to ~256 KiB.
    cb_target = max(8, ((512 // max(L, 1)) // 8) * 8)

    def _vmem_bytes(bt):
        cbt = min(bt, cb_target)
        inp = 2 * bt * L * K * 2                         # double-buffered bf16 in
        out = 2 * bt * cpad * 4                          # double-buffered f32 out
        res = K * cpad * 2 + L * cpad * 4 + cpad * 4     # resident w / mask / bias
        tmp = 2 * cbt * L * cpad * 4                     # live f32 chunk values
        return inp + out + res + tmp

    VMEM_BUDGET = 36 * 1024 * 1024                       # safe on v7x (64 MiB VMEM)
    while b_tile > 8 and _vmem_bytes(b_tile) > VMEM_BUDGET:
        b_tile = max(8, ((b_tile // 2) // 8) * 8)

    cb = min(b_tile, cb_target)
    while b_tile % cb != 0:
        cb -= 8

    b_pad = _round_up(B, b_tile)
    if b_pad != B:
        x_im = jnp.pad(x_im, ((0, b_pad - B), (0, 0), (0, 0)))
    x2 = x_im.reshape(b_pad * L, K)

    vmem_limit = int(min(48 * 1024 * 1024,
                         max(32 * 1024 * 1024, int(_vmem_bytes(b_tile) * 1.5))))

    kernel = functools.partial(_textcnn_pool_kernel, b_tile, L, cb)
    pooled = pl.pallas_call(
        kernel,
        out_shape=jax.ShapeDtypeStruct((b_pad, cpad), jnp.float32),
        grid=(b_pad // b_tile,),
        in_specs=[
            pl.BlockSpec((b_tile * L, K), lambda b: (b, 0)),   # activations
            pl.BlockSpec((K, cpad), lambda b: (0, 0)),         # weights (resident)
            pl.BlockSpec((L, cpad), lambda b: (0, 0)),         # additive mask
            pl.BlockSpec((1, cpad), lambda b: (0, 0)),         # bias
        ],
        out_specs=pl.BlockSpec((b_tile, cpad), lambda b: (b, 0)),
        compiler_params=pltpu.CompilerParams(
            dimension_semantics=("parallel",),
            vmem_limit_bytes=vmem_limit),
        interpret=interpret,
    )(x2, w_flat, mask, b_packed)

    pooled = pooled[:B, :cn]                   # drop batch / channel padding
    # Tiny (n*C -> 2) linear hoisted out of the kernel; dropout is identity.
    return pooled @ lin_weight.T + lin_bias[None, :]


def reference_forward(token_ids, embed_table, conv_weights, conv_biases,
                      lin_weight, lin_bias, filter_sizes):
    """Pure-JAX reference mirroring the PyTorch module (matmul inputs rounded
    to bf16 so the comparison against the bf16-MXU kernel is tight)."""
    x = jnp.take(embed_table, token_ids, axis=0)
    x = x.astype(jnp.bfloat16).astype(jnp.float32)              # (B, L, E)
    B, L, _ = x.shape
    feats = []
    for fs, w, b in zip(filter_sizes, conv_weights, conv_biases):
        w = w.astype(jnp.bfloat16).astype(jnp.float32)          # (C, E, fs)
        lout = L - fs + 1
        acc = jnp.zeros((B, lout, w.shape[0]), jnp.float32)
        for k in range(fs):
            acc = acc + jnp.einsum("ble,ce->blc", x[:, k:k + lout, :], w[:, :, k])
        acc = jnp.maximum(acc + b[None, None, :], 0.0)          # bias + relu
        feats.append(jnp.max(acc, axis=1))                      # adaptive_max_pool1d(1)
    cat = jnp.concatenate(feats, axis=-1)                       # (B, n*C)
    return cat @ lin_weight.T + lin_bias[None, :]


if __name__ == "__main__":
    key = jax.random.PRNGKey(0)

    vocab = 20
    B, L = 16, 16             # batch, sequence length (2 grid steps of 8)
    E = 32                    # embedding dim == conv in_channels
    C = 8                     # conv out_channels
    filter_sizes = (2, 3, 4)  # Conv1dList kernel sizes (max_fs*E = 128 = K)
    n_classes = 2

    keys = jax.random.split(key, 4 + 2 * len(filter_sizes))
    embed_table = jax.random.normal(keys[0], (vocab, E), jnp.float32) * 0.1

    conv_weights, conv_biases = [], []
    for i, fs in enumerate(filter_sizes):
        conv_weights.append(
            jax.random.normal(keys[1 + 2 * i], (C, E, fs), jnp.float32) * 0.05)
        conv_biases.append(
            jax.random.normal(keys[2 + 2 * i], (C,), jnp.float32) * 0.05)

    in_feat = C * len(filter_sizes)
    lin_weight = jax.random.normal(keys[-2], (n_classes, in_feat), jnp.float32) * 0.05
    lin_bias = jax.random.normal(keys[-1], (n_classes,), jnp.float32) * 0.05

    token_ids = jax.random.randint(jax.random.PRNGKey(123), (B, L), 0, vocab,
                                   dtype=jnp.int32)

    out = textcnn_forward(token_ids, embed_table, conv_weights, conv_biases,
                          lin_weight, lin_bias, filter_sizes)
    out = jax.block_until_ready(out)

    ref = reference_forward(token_ids, embed_table, conv_weights, conv_biases,
                            lin_weight, lin_bias, filter_sizes)
    assert out.shape == (B, n_classes)
    assert jnp.allclose(out, ref, atol=2e-3, rtol=2e-3), (out, ref)

    print("KERNEL_OK")
</pallas_src>

<mosaic_0001>
module attributes {stable_mosaic.version = 11 : i64} {
  func.func @_textcnn_pool_kernel(%arg0: i32, %arg1: memref<128x128xbf16, #tpu.memory_space<vmem>>, %arg2: memref<128x128xbf16, #tpu.memory_space<vmem>>, %arg3: memref<16x128xf32, #tpu.memory_space<vmem>>, %arg4: memref<1x128xf32, #tpu.memory_space<vmem>>, %arg5: memref<8x128xf32, #tpu.memory_space<vmem>>) attributes {dimension_semantics = [#tpu.dimension_semantics<parallel>], iteration_bounds = array<i64: 2>, scalar_prefetch = 0 : i64, scratch_operands = 0 : i64, tpu.core_type = #tpu.core_type<tc>, window_params = [{transform_indices = @transform_0, window_bounds = array<i64: 128, 128>}, {pipeline_mode = #tpu.pipeline_mode<synchronous>, transform_indices = @transform_1, window_bounds = array<i64: 128, 128>}, {pipeline_mode = #tpu.pipeline_mode<synchronous>, transform_indices = @transform_2, window_bounds = array<i64: 16, 128>}, {pipeline_mode = #tpu.pipeline_mode<synchronous>, transform_indices = @transform_3, window_bounds = array<i64: 1, 128>}, {transform_indices = @transform_4, window_bounds = array<i64: 8, 128>}]} {
    %c0 = arith.constant 0 : index
    %c0_0 = arith.constant 0 : index
    %0 = vector.load %arg2[%c0, %c0_0] : memref<128x128xbf16, #tpu.memory_space<vmem>>, vector<128x128xbf16>
    %c0_1 = arith.constant 0 : index
    %c0_2 = arith.constant 0 : index
    %1 = vector.load %arg3[%c0_1, %c0_2] : memref<16x128xf32, #tpu.memory_space<vmem>>, vector<16x128xf32>
    %c0_3 = arith.constant 0 : index
    %c0_4 = arith.constant 0 : index
    %2 = vector.load %arg4[%c0_3, %c0_4] : memref<1x128xf32, #tpu.memory_space<vmem>>, vector<1x128xf32>
    %c0_5 = arith.constant 0 : index
    %c0_6 = arith.constant 0 : index
    %3 = vector.load %arg1[%c0_5, %c0_6] : memref<128x128xbf16, #tpu.memory_space<vmem>>, vector<128x128xbf16>
    %cst = arith.constant dense<0.000000e+00> : vector<128x128xf32>
    %4 = tpu.matmul %3, %0, %cst {dimension_numbers = #tpu.dot_dimension_numbers<[1], [0], [0], [1], [0, 0, 1, 1], [], []>} : vector<128x128xbf16>, vector<128x128xbf16>, vector<128x128xf32> -> vector<128x128xf32>
    %5 = vector.shape_cast %4 : vector<128x128xf32> to vector<8x16x128xf32>
    %6 = vector.shape_cast %1 : vector<16x128xf32> to vector<1x16x128xf32>
    %7 = vector.broadcast %6 : vector<1x16x128xf32> to vector<8x16x128xf32>
    %8 = arith.addf %5, %7 : vector<8x16x128xf32>
    %cst_7 = arith.constant dense<0xFF800000> : vector<8x128xf32>
    %9 = vector.multi_reduction <maximumf>, %8, %cst_7 [1] : vector<8x16x128xf32> to vector<8x128xf32>
    %10 = vector.broadcast %2 : vector<1x128xf32> to vector<8x128xf32>
    %11 = arith.addf %9, %10 : vector<8x128xf32>
    %cst_8 = arith.constant 0.000000e+00 : f32
    %12 = vector.broadcast %cst_8 : f32 to vector<8x128xf32>
    %13 = arith.maximumf %11, %12 : vector<8x128xf32>
    %c0_9 = arith.constant 0 : index
    %c0_10 = arith.constant 0 : index
    %14 = vector.load %arg5[%c0_9, %c0_10] : memref<8x128xf32, #tpu.memory_space<vmem>>, vector<8x128xf32>
    tpu.vector_store %arg5[%c0_9, %c0_10], %13 {strides = array<i32>} : memref<8x128xf32, #tpu.memory_space<vmem>>, vector<8x128xf32>,
    return
  }
  func.func @transform_0(%arg0: i32) -> (i32, i32) {
    %c0_i32 = arith.constant 0 : i32
    %c0_i32_0 = arith.constant 0 : i32
    return %arg0, %c0_i32 : i32, i32
  }
  func.func @transform_1(%arg0: i32) -> (i32, i32) {
    %c0_i32 = arith.constant 0 : i32
    %c0_i32_0 = arith.constant 0 : i32
    %c0_i32_1 = arith.constant 0 : i32
    return %c0_i32, %c0_i32_0 : i32, i32
  }
  func.func @transform_2(%arg0: i32) -> (i32, i32) {
    %c0_i32 = arith.constant 0 : i32
    %c0_i32_0 = arith.constant 0 : i32
    %c0_i32_1 = arith.constant 0 : i32
    return %c0_i32, %c0_i32_0 : i32, i32
  }
  func.func @transform_3(%arg0: i32) -> (i32, i32) {
    %c0_i32 = arith.constant 0 : i32
    %c0_i32_0 = arith.constant 0 : i32
    %c0_i32_1 = arith.constant 0 : i32
    return %c0_i32, %c0_i32_0 : i32, i32
  }
  func.func @transform_4(%arg0: i32) -> (i32, i32) {
    %c0_i32 = arith.constant 0 : i32
    %c0_i32_0 = arith.constant 0 : i32
    return %arg0, %c0_i32 : i32, i32
  }
}

</mosaic_0001>

<bundles_post_ra>
// kernel: tpu_custom_call.1
= control target key start
LH: loop header
LB: loop body
LE: loop exit
PB: predicated region body
PF: predicated region fallthrough
CT: control target
= control target key end

     0   :  { %9 = vsyncpa [#allocation3], 0  ;;  %s1332_s0 = inlined_call_operand.hbm [shape: bf16[256,128], index: 0, kind: input, shape index: {}]   ;;  %s1333_s1 = inlined_call_operand.hbm [shape: bf16[128,128], index: 1, kind: input, shape index: {}]   ;;  %s1334_s2 = inlined_call_operand.hbm [shape: f32[16,128], index: 2, kind: input, shape index: {}]   ;;  %s1335_s3 = inlined_call_operand.vmem [shape: f32[1,128], index: 3, kind: input, shape index: {}]   ;;  %s1336_s4 = inlined_call_operand.hbm [shape: f32[16,128], index: 4, kind: output, shape index: {}]  }
   0x1   :  { %11 = vsyncpa [#allocation3 + $0x1], 0 }
   0x2   :  { %12 = vsyncpa [#allocation6], 0 }
   0x3   :  { %13 = vsyncpa [#allocation4], 0 }
   0x4   :  { %15 = vsyncpa [#allocation4 + $0x1], 0  ;;  %s1080_s15 = smov 0   ;;  %s1082_s16 = smov 0  }
   0x5   :  { %s1084_s17 = smov 0   ;;  %s1086_s18 = smov 0  }
   0x6 LB: > { %s1101_s19 = sadd.s32 4294967295, %s1045_s18   ;;  %s703_s20 = sadd.s32 4294967294, %s1045_s18   ;;  %s1045_s18 = sphi %s1086_s18, %s1356_s18   ;;  %s1041_s17 = sphi %s1084_s17, %s1355_s17   ;;  %s1037_s16 = sphi %s1082_s16, %s1354_s16   ;;  %s1033_s15 = sphi %s1080_s15, %s1353_s15  }
   0x7   : > { %p41_p0 = scmp.ne.s32.totalorder %s1037_s16, %s1033_s15  ;;  %p1337_p1 = scmp.eq.s32.totalorder %s1101_s19, 0 }
   0x8   : > { %p134_p3 = scmp.eq.s32.totalorder %s703_s20, 1  ;;  %p704_p5 = scmp.ge.s32.totalorder %s1045_s18, 1 }
   0x9   : > { %p1110_p4 = por %p1337_p1, %p41_p0  ;;  %p141_p7 = scmp.lt.s32.totalorder %s1045_s18, 3 }
   0xa   : > { %p1115_p6 = por %p134_p3, %p41_p0  ;;  %s1047_s24 = smov [#allocation5]  }
   0xb   : > { %s1340_s21 = scalar_select %p1110_p4, 1, 0 }
   0xc   : > { %s1341_s22 = scalar_select %p1115_p6, 1, 0 }
   0xd   : > { %p1120_p8 = pnand %p704_p5, %p141_p7  ;;  %s153_s25 = sshll.u32 %s1047_s24, 4  ;;  %s1124_s25 = int_to_ptr.vmem [resolvable:$true] %s153_s25 }
   0xe   : > { %s1048_s27 = smov [#allocation7]   ;;  %s889_s5 = scalar_lea.hbm %s1333_s1, 1024 }
   0xf   : > { %p814_p9 = pneg %p1120_p8  ;;  %s166_s28 = sshll.u32 %s1048_s27, 4  ;;  %s1135_s28 = int_to_ptr.vmem [resolvable:$true] %s166_s28 }
  0x10   : > { %p890_p12 = scmp.ne.s32.totalorder %s1333_s1, %s889_s5  ;;  %p896_p5 = scmp.lt.u32.totalorder %s889_s5, %s1333_s1 }
  0x11   : > { %p1131_p11 = pnand %p814_p9, %p1337_p1 }
  0x13   : > { %p891_p13 = pneg %p1131_p11 }
  0x15   : > { %p892_p0 = pnand %p891_p13, %p890_p12 }
  0x17   : > { %p893_p3 = pneg %p892_p0 }
  0x19   : > { %p898_p7 = pnand %p896_p5, %p893_p3 }
  0x1b   : > { %901 = shalt.err (!%p898_p7)
}
  0x1c   : > { %s902_s10 = scalar_lea.vmem %s1124_s25, 1024  ;;  %p910_p2 = scmp.lt.s32.totalorder %s1124_s25, %s1124_s25 }
  0x1d   : > { %p903_p9 = scmp.ne.s32.totalorder %s1124_s25, %s902_s10  ;;  %p911_p12 = scmp.lt.s32.totalorder %s902_s10, %s902_s10 }
  0x1f   : > { %p905_p10 = pnand %p903_p9, %p891_p13  ;;  %p912_p0 = por %p911_p12, %p910_p2 }
  0x21   : > { %p906_p1 = pneg %p905_p10 }
  0x23   : > { %p913_p6 = pnand %p912_p0, %p906_p1 }
  0x25   : > { %916 = shalt.err (!%p913_p6)
}
  0x26   : > { %s1049_s11 = smov 64   ;;  %s1050_s12 = smov 4  }
  0x27   : > { %817 = dma.hbm_to_vmem [thread:$0]  (!%p1131_p11), %s1333_s1, 1024, %s1124_s25, [#allocation6], %s1049_s11, %s1049_s11, %s1050_s12  }
  0x28   : > { %s917_s27 = scalar_lea.hbm %s1334_s2, 256 }
  0x29   : > { %p918_p1 = scmp.ne.s32.totalorder %s1334_s2, %s917_s27  ;;  %p924_p10 = scmp.lt.u32.totalorder %s917_s27, %s1334_s2 }
  0x2b   : > { %p920_p2 = pnand %p918_p1, %p891_p13 }
  0x2d   : > { %p921_p6 = pneg %p920_p2 }
  0x2f   : > { %p926_p3 = pnand %p924_p10, %p921_p6 }
  0x31   : > { %929 = shalt.err (!%p926_p3)
}
  0x32   : > { %s930_s25 = scalar_lea.vmem %s1135_s28, 256  ;;  %p938_p12 = scmp.lt.s32.totalorder %s1135_s28, %s1135_s28 }
  0x33   : > { %p931_p5 = scmp.ne.s32.totalorder %s1135_s28, %s930_s25  ;;  %p939_p0 = scmp.lt.s32.totalorder %s930_s25, %s930_s25 }
  0x35   : > { %p933_p7 = pnand %p931_p5, %p891_p13  ;;  %p940_p1 = por %p939_p0, %p938_p12 }
  0x37   : > { %p934_p9 = pneg %p933_p7 }
  0x39   : > { %p941_p2 = pnand %p940_p1, %p934_p9 }
  0x3b   : > { %944 = shalt.err (!%p941_p2)
}
  0x3c   : > { %s1051_s7 = smov 128   ;;  %s1052_s8 = smov 8  }
  0x3d   : > { %820 = dma.hbm_to_vmem [thread:$0]  (!%p1131_p11), %s1334_s2, 256, %s1135_s28, [#allocation6], %s1051_s7, %s1051_s7, %s1052_s8  }
  0x3e   : > { %s1193_s13 = sadd.s32 1, %s1045_s18   ;;  %s28_s20 = sadd.s32 1, %s1041_s17 }
  0x3f   : > { %s25_s14 = ssub.s32 %s1045_s18, %s1193_s13  ;;  %p35_p6 = scmp.ne.s32.totalorder %s1041_s17, %s1037_s16 }
  0x40   : > { %p26_p13 = scmp.eq.s32.totalorder %s25_s14, 0  ;;  %p36_p10 = scmp.eq.s32.totalorder %s1045_s18, 0 }
  0x41   : > { %p1344_p5 = scmp.eq.s32.totalorder %s1101_s19, 1  ;;  %p831_p9 = scmp.lt.s32.totalorder %s1045_s18, 2 }
  0x42   : > { %s1202_s24 = scalar_select %p26_p13, %s1041_s17, %s28_s20  }
  0x43   : > { %p37_p3 = por %p36_p10, %p35_p6  ;;  %p1206_p7 = por %p1344_p5, %p35_p6 }
  0x44   : > { %s183_s26 = sand.u32 1, %s1041_s17   ;;  %s737_s28 = sshll.u32 %s1045_s18, 10 }
  0x45   : > { %s1345_s27 = scalar_select %p1206_p7, 1, 0 }
  0x46   : > { %s708_s29 = sshll.u32 %s183_s26, 6  ;;  %s1216_s6 = scalar_lea.hbm %s1332_s0, %s737_s28 }
  0x47   : > { %s187_s25 = scalar_lea.vmem [#allocation2], %s708_s29  ;;  %p1220_p11 = pnand %p831_p9, %p37_p3 }
  0x48   : > { %s194_s7 = sshll.u32 %s187_s25, 4  ;;  %s1224_s9 = scalar_lea.sflag [#allocation3], %s183_s26  ;;  %s1218_s7 = int_to_ptr.vmem [resolvable:$true] %s194_s7 }
  0x49   : > { %s945_s10 = scalar_lea.hbm %s1216_s6, 1024  ;;  %p947_p0 = pneg %p1220_p11 }
  0x4a   : > { %p946_p12 = scmp.ne.s32.totalorder %s1216_s6, %s945_s10  ;;  %s950_s29 = scalar_lea.hbm %s1332_s0, 2048 }
  0x4b   : > { %p951_p13 = scmp.lt.u32.totalorder %s1216_s6, %s1332_s0  ;;  %p952_p6 = scmp.lt.u32.totalorder %s950_s29, %s945_s10 }
  0x4c   : > { %p948_p1 = pnand %p947_p0, %p946_p12  ;;  %p954_p3 = scmp.lt.u32.totalorder %s945_s10, %s1216_s6 }
  0x4d   : > { %p953_p10 = por %p952_p6, %p951_p13 }
  0x4e   : > { %p949_p2 = pneg %p948_p1 }
  0x4f   : > { %p955_p5 = por %p954_p3, %p953_p10 }
  0x51   : > { %p956_p9 = pnand %p955_p5, %p949_p2 }
  0x53   : > { %959 = shalt.err (!%p956_p9)
}
  0x54   : > { %s960_s26 = scalar_lea.vmem %s1218_s7, 1024  ;;  %s1053_s5 = smov [#allocation2]  }
  0x55   : > { %p961_p12 = scmp.ne.s32.totalorder %s1218_s7, %s960_s26  ;;  %s965_s25 = sshll.u32 %s1053_s5, 4  ;;  %s966_s25 = int_to_ptr.vmem [resolvable:$false] %s965_s25 }
  0x56   : > { %s967_s14 = scalar_lea.vmem %s966_s25, 2048  ;;  %p968_p4 = scmp.lt.s32.totalorder %s1218_s7, %s966_s25 }
  0x57   : > { %p963_p1 = pnand %p961_p12, %p947_p0  ;;  %p969_p13 = scmp.lt.s32.totalorder %s967_s14, %s960_s26 }
  0x59   : > { %p964_p7 = pneg %p963_p1  ;;  %p970_p6 = por %p969_p13, %p968_p4 }
  0x5b   : > { %p971_p10 = pnand %p970_p6, %p964_p7 }
  0x5d   : > { %974 = shalt.err (!%p971_p10)
}
  0x5e   : > { %824 = dma.hbm_to_vmem [thread:$0]  (!%p1220_p11), %s1216_s6, 1024, %s1218_s7, %s1224_s9, %s1049_s11, %s1049_s11, %s1050_s12  }
  0x5f   : > { %206 = sbr.rel (%p1120_p8) target bundleno = 404 (0x194), region = 36  ;;  %s1258_s10 = sand.u32 (!%p1120_p8), 1, %s1037_s16  }
  0x60   : > { %s712_s20 = sshll.u32 (!%p1120_p8), %s1258_s10, 6  ;;  %s209_s29 = scalar_lea.sflag (!%p1120_p8), [#allocation3], %s1258_s10 }
  0x61   : > { %s1262_s28 = scalar_lea.vmem (!%p1120_p8), [#allocation2], %s712_s20  ;;  %p1347_p4 = scmp.ne.s32.totalorder (!%p1120_p8), %s1340_s21, 0 }
  0x66   : > { %1020 = dma.done.wait (%p1347_p4), %s209_s29, 1024  }
  0x67   : > { %1022 = vsyncadd (%p1347_p4), %s209_s29, 4294966272  ;;  %p1348_p7 = scmp.eq.s32.totalorder %s1101_s19, 0 }
  0x69   : > { %1024 = dma.done.wait (%p1348_p7), [#allocation6], 1280   ;;  %p1349_p8 = pmov %p1348_p7 }
  0x6a   : > { %v873_v0 = vld [vmem:[#allocation5] sm:$0xff]   ;;  %v874_v1 = vld [vmem:[#allocation5 + $0x8] sm:$0xff]   ;;  %v875_v2 = vld [vmem:[#allocation5 + $0x10] sm:$0xff]   ;;  %vm578_vm0 = vcmask 1041409   ;;  %s715_s11 = sshll.u32 %s1258_s10, 3  ;;  %vm581_vm1 = vcmask 1042434  }
  0x6b   : > { %1026 = vsyncadd (%p1349_p8), [#allocation6], 4294966016  ;;  %754 = vmatprep.subr.bf16.mxu0 %v873_v0  ;;  %786 = vmatprep.subr.bf16.mxu1 %v873_v0  ;;  %v876_v3 = vld [vmem:[#allocation5 + $0x18] sm:$0xff]   ;;  %v881_v4 = vld [vmem:[%s1262_s28] sm:$0xff]   ;;  %vm584_vm2 = vcmask 1043459   ;;  %vm587_vm3 = vcmask 1044484  }
  0x6c   : > { %755 = vmatpush3.bf16.msra.mxu0 %v873_v0  ;;  %794 = vmatpush3.bf16.msra.mxu1 %v873_v0  ;;  %v882_v5 = vld [vmem:[%s1262_s28 + $0x20] sm:$0xff]   ;;  %v878_v7 = vld [vmem:[#allocation5 + $0x28] sm:$0xff]   ;;  %v879_v8 = vld [vmem:[#allocation5 + $0x30] sm:$0xff]   ;;  %vm590_vm4 = vcmask 1045509   ;;  %vm593_vm5 = vcmask 1046534   ;;  %s734_s12 = sshll.u32 %s1101_s19, 7 }
  0x6d   : > { %756 = vmatprep.subr.bf16.mxu0 %v874_v1  ;;  %787 = vmatprep.subr.bf16.mxu1 %v874_v1  ;;  %v877_v6 = vld [vmem:[#allocation5 + $0x20] sm:$0xff]   ;;  %v880_v9 = vld [vmem:[#allocation5 + $0x38] sm:$0xff]   ;;  %v883_v10 = vld [vmem:[%s1262_s28 + $0x8] sm:$0xff]   ;;  %s244_s6 = scalar_lea.vmem [#allocation8], %s715_s11  ;;  %vm596_vm6 = vcmask 1047559   ;;  %s1288_s30 = scalar_lea.hbm %s1336_s4, %s734_s12 }
  0x6e   : > { %770 = vmatprep.mubr.bf16.mxu0 %v881_v4  ;;  %778 = vmatprep.mubr.bf16.mxu1 %v882_v5  ;;  %v884_v11 = vld [vmem:[%s1262_s28 + $0x28] sm:$0xff]   ;;  %v885_v12 = vld [vmem:[%s1262_s28 + $0x10] sm:$0xff]   ;;  %v887_v14 = vld [vmem:[%s1262_s28 + $0x18] sm:$0xff]   ;;  %s614_s7 = sshll.u32 %s244_s6, 4  ;;  %s601_s19 = scalar_lea.sflag [#allocation4], %s1258_s10  ;;  %s1290_s7 = int_to_ptr.vmem [resolvable:$true] %s614_s7 }
  0x6f   : > { %v886_v13 = vld [vmem:[%s1262_s28 + $0x30] sm:$0xff]   ;;  %v888_v15 = vld [vmem:[%s1262_s28 + $0x38] sm:$0xff]   ;;  %v263_v16 = vld [vmem:[#allocation7] sm:$0xff]  ;;  %s975_s26 = scalar_lea.vmem %s1290_s7, 128  ;;  %p1350_p0 = scmp.ne.s32.totalorder %s1345_s27, 0 }
  0x70   : > { %757 = vmatpush3.bf16.msra.mxu0 %v874_v1  ;;  %795 = vmatpush3.bf16.msra.mxu1 %v874_v1  ;;  %v264_v19 = vld [vmem:[#allocation7 + $0x8] sm:$0xff]  ;;  %p976_p11 = scmp.ne.s32.totalorder %s1290_s7, %s975_s26  ;;  %s1054_s5 = smov [#allocation8]  }
  0x71   : > { %758 = vmatprep.subr.bf16.mxu0 %v875_v2  ;;  %788 = vmatprep.subr.bf16.mxu1 %v875_v2  ;;  %s979_s25 = sshll.u32 %s1054_s5, 4  ;;  %s980_s25 = int_to_ptr.vmem [resolvable:$false] %s979_s25 }
  0x72   : > { %p977_p2 = pnand %p976_p11, %p1350_p0  ;;  %s981_s14 = scalar_lea.vmem %s980_s25, 256 }
  0x73   : > { %p982_p5 = scmp.lt.s32.totalorder %s1290_s7, %s980_s25  ;;  %p983_p9 = scmp.lt.s32.totalorder %s981_s14, %s975_s26 }
  0x74   : > { %759 = vmatpush3.bf16.msra.mxu0 %v875_v2  ;;  %796 = vmatpush3.bf16.msra.mxu1 %v875_v2  ;;  %p978_p3 = pneg %p977_p2 }
  0x75   : > { %760 = vmatprep.subr.bf16.mxu0 %v876_v3  ;;  %789 = vmatprep.subr.bf16.mxu1 %v876_v3  ;;  %p984_p12 = por %p983_p9, %p982_p5 }
  0x77   : > { %p985_p1 = pnand %p984_p12, %p978_p3 }
  0x78   : > { %761 = vmatpush3.bf16.msra.mxu0 %v876_v3  ;;  %797 = vmatpush3.bf16.msra.mxu1 %v876_v3 }
  0x79   : > { %762 = vmatprep.subr.bf16.mxu0 %v877_v6  ;;  %790 = vmatprep.subr.bf16.mxu1 %v877_v6 }
  0x7c   : > { %763 = vmatpush3.bf16.msra.mxu0 %v877_v6  ;;  %798 = vmatpush3.bf16.msra.mxu1 %v877_v6 }
  0x7d   : > { %764 = vmatprep.subr.bf16.mxu0 %v878_v7  ;;  %791 = vmatprep.subr.bf16.mxu1 %v878_v7 }
  0x80   : > { %765 = vmatpush3.bf16.msra.mxu0 %v878_v7  ;;  %799 = vmatpush3.bf16.msra.mxu1 %v878_v7 }
  0x81   : > { %766 = vmatprep.subr.bf16.mxu0 %v879_v8  ;;  %792 = vmatprep.subr.bf16.mxu1 %v879_v8 }
  0x84   : > { %767 = vmatpush3.bf16.msra.mxu0 %v879_v8  ;;  %800 = vmatpush3.bf16.msra.mxu1 %v879_v8 }
  0x85   : > { %768 = vmatprep.subr.bf16.mxu0 %v880_v9  ;;  %793 = vmatprep.subr.bf16.mxu1 %v880_v9 }
  0x88   : > { %769 = vmatpush3.bf16.msra.mxu0 %v880_v9  ;;  %801 = vmatpush3.bf16.msra.mxu1 %v880_v9 }
  0x8b   : > { %771 = vmatmul.mubr.bf16.vlgmr.msra.gmra.mrb[0].mxu0 %v883_v10  ;;  %779 = vmatmul.mubr.bf16.vlgmr.msra.gmra.mrb[0].mxu1 %v884_v11 }
  0x8c   : > { %774 = vmatprep.mubr.bf16.mxu0 %v885_v12  ;;  %782 = vmatprep.mubr.bf16.mxu1 %v886_v13  ;;  %v732_v13 = vld [vmem:[%s1335_s3] ss:$0 sm:$0xff] }
  0x93   : > { %775 = vmatmul.mubr.bf16.gmra.mrb[4].mxu0 %v887_v14  ;;  %783 = vmatmul.mubr.bf16.gmra.mrb[4].mxu1 %v888_v15 }
 0x15e   : > { %v772_v17 = vpop.f32.mrb[0].mxu0  ;;  %v780_v18 = vpop.f32.mrb[0].mxu1 }
 0x15f   : > { %v485_v20 = vadd.f32 %v780_v18, %v263_v16  ;;  %v412_v21 = vpop.f32.mrb[1].mxu0  ;;  %v444_v22 = vpop.f32.mrb[1].mxu1  ;;  %v477_v26 = vadd.f32 %v772_v17, %v263_v16 }
 0x160   : > { %v483_v23 = vadd.f32 %v444_v22, %v263_v16  ;;  %v773_v24 = vpop.f32.mrb[2].mxu0  ;;  %v781_v25 = vpop.f32.mrb[2].mxu1  ;;  %v475_v31 = vadd.f32 %v412_v21, %v263_v16 }
 0x161   : > { %v478_v27 = vadd.f32 %v773_v24, %v264_v19  ;;  %v486_v28 = vadd.f32 %v781_v25, %v264_v19  ;;  %v415_v29 = vpop.f32.mrb[3].mxu0  ;;  %v447_v30 = vpop.f32.mrb[3].mxu1 }
 0x162   : > { %v476_v32 = vadd.f32 %v415_v29, %v264_v19  ;;  %v484_v33 = vadd.f32 %v447_v30, %v264_v19 }
 0x163   : > { %v498_v34 = vmax.f32 %v477_v26, %v478_v27  ;;  %v526_v35 = vmax.f32 %v485_v20, %v486_v28 }
 0x164   : > { %v491_v36 = vmax.f32 %v475_v31, %v476_v32  ;;  %v519_v37 = vmax.f32 %v483_v23, %v484_v33 }
 0x165   : > { %v499_v38 = vrot.slane %v498_v34, 4  ;;  %v527_v39 = vrot.slane %v526_v35, 4 }
 0x166   : > { %v492_v40 = vrot.slane %v491_v36, 4  ;;  %v520_v41 = vrot.slane %v519_v37, 4  ;;  %v776_v42 = vpop.f32.mrb[4].mxu0  ;;  %v784_v43 = vpop.f32.mrb[4].mxu1 }
 0x167   : > { %v500_v44 = vmax.f32 %v498_v34, %v499_v38  ;;  %v528_v45 = vmax.f32 %v526_v35, %v527_v39  ;;  %v481_v46 = vadd.f32 %v776_v42, %v263_v16  ;;  %v489_v47 = vadd.f32 %v784_v43, %v263_v16  ;;  %v428_v48 = vpop.f32.mrb[5].mxu0  ;;  %v460_v49 = vpop.f32.mrb[5].mxu1 }
 0x168   : > { %v493_v50 = vmax.f32 %v491_v36, %v492_v40  ;;  %v521_v51 = vmax.f32 %v519_v37, %v520_v41  ;;  %v479_v52 = vadd.f32 %v428_v48, %v263_v16  ;;  %v487_v53 = vadd.f32 %v460_v49, %v263_v16  ;;  %v777_v54 = vpop.f32.mrb[6].mxu0  ;;  %v785_v55 = vpop.f32.mrb[6].mxu1 }
 0x169   : > { %v501_v56 = vrot.slane %v500_v44, 2  ;;  %v529_v57 = vrot.slane %v528_v45, 2  ;;  %v482_v58 = vadd.f32 %v777_v54, %v264_v19  ;;  %v490_v59 = vadd.f32 %v785_v55, %v264_v19  ;;  %v431_v60 = vpop.f32.mrb[7].mxu0  ;;  %v463_v61 = vpop.f32.mrb[7].mxu1 }
 0x16a   : > { %v494_v62 = vrot.slane %v493_v50, 2  ;;  %v522_v63 = vrot.slane %v521_v51, 2  ;;  %v480_v0 = vadd.f32 %v431_v60, %v264_v19  ;;  %v488_v1 = vadd.f32 %v463_v61, %v264_v19 }
 0x16b   : > { %v502_v2 = vmax.f32 %v500_v44, %v501_v56  ;;  %v512_v3 = vmax.f32 %v481_v46, %v482_v58  ;;  %v540_v4 = vmax.f32 %v489_v47, %v490_v59  ;;  %v530_v10 = vmax.f32 %v528_v45, %v529_v57 }
 0x16c   : > { %v495_v5 = vmax.f32 %v493_v50, %v494_v62  ;;  %v523_v6 = vmax.f32 %v521_v51, %v522_v63  ;;  %v505_v7 = vmax.f32 %v479_v52, %v480_v0  ;;  %v533_v8 = vmax.f32 %v487_v53, %v488_v1 }
 0x16d   : > { %v503_v9 = vrot.slane %v502_v2, 1  ;;  %v513_v11 = vrot.slane %v512_v3, 4  ;;  %v541_v12 = vrot.slane %v540_v4, 4  ;;  %v531_v25 = vrot.slane %v530_v10, 1 }
 0x16e   : > { %v496_v14 = vrot.slane %v495_v5, 1  ;;  %v506_v15 = vrot.slane %v505_v7, 4  ;;  %v534_v16 = vrot.slane %v533_v8, 4  ;;  %v524_v21 = vrot.slane %v523_v6, 1 }
 0x16f   : > { %v504_v17 = vmax.f32 %v502_v2, %v503_v9  ;;  %v514_v18 = vmax.f32 %v512_v3, %v513_v11  ;;  %v542_v19 = vmax.f32 %v540_v4, %v541_v12  ;;  %v532_v39 = vmax.f32 %v530_v10, %v531_v25 }
 0x170   : > { %v497_v20 = vmax.f32 %v495_v5, %v496_v14  ;;  %v507_v22 = vmax.f32 %v505_v7, %v506_v15  ;;  %v535_v23 = vmax.f32 %v533_v8, %v534_v16  ;;  %v525_v35 = vmax.f32 %v523_v6, %v524_v21 }
 0x171   : > { %v554_v24 = vadd.f32 %v732_v13, %v504_v17  ;;  %v515_v26 = vrot.slane %v514_v18, 2  ;;  %v543_v27 = vrot.slane %v542_v19, 2  ;;  %v558_v50 = vadd.f32 %v732_v13, %v532_v39 }
 0x172   : > { %v553_v28 = vadd.f32 %v732_v13, %v497_v20  ;;  %v508_v29 = vrot.slane %v507_v22, 2  ;;  %v536_v30 = vrot.slane %v535_v23, 2  ;;  %v557_v47 = vadd.f32 %v732_v13, %v525_v35 }
 0x173   : > { %v562_v31 = vmax.f32 %v554_v24, 0.0  ;;  %v516_v32 = vmax.f32 %v514_v18, %v515_v26  ;;  %v544_v33 = vmax.f32 %v542_v19, %v543_v27  ;;  %v566_v58 = vmax.f32 %v558_v50, 0.0 }
 0x174   : > { %v561_v34 = vmax.f32 %v553_v28, 0.0  ;;  %v509_v36 = vmax.f32 %v507_v22, %v508_v29  ;;  %v537_v37 = vmax.f32 %v535_v23, %v536_v30  ;;  %v565_v56 = vmax.f32 %v557_v47, 0.0 }
 0x175   : > { %v577_v38 = vrot.slane %v562_v31, 7  ;;  %v517_v40 = vrot.slane %v516_v32, 1  ;;  %v545_v41 = vrot.slane %v544_v33, 1  ;;  %v589_v1 = vrot.slane %v566_v58, 3 }
 0x176   : > { %v510_v42 = vrot.slane %v509_v36, 1  ;;  %v538_v43 = vrot.slane %v537_v37, 1  ;;  %v586_v63 = vrot.slane %v565_v56, 4 }
 0x177   : > { %v579_v44 = vsel %vm578_vm0, %v577_v38, %v561_v34  ;;  %v518_v45 = vmax.f32 %v516_v32, %v517_v40  ;;  %v546_v46 = vmax.f32 %v544_v33, %v545_v41 }
 0x178   : > { %v511_v48 = vmax.f32 %v509_v36, %v510_v42  ;;  %v539_v49 = vmax.f32 %v537_v37, %v538_v43 }
 0x179   : > { %v556_v51 = vadd.f32 %v732_v13, %v518_v45  ;;  %v560_v55 = vadd.f32 %v732_v13, %v546_v46 }
 0x17a   : > { %v555_v52 = vadd.f32 %v732_v13, %v511_v48  ;;  %v559_v53 = vadd.f32 %v732_v13, %v539_v49 }
 0x17b   : > { %v564_v54 = vmax.f32 %v556_v51, 0.0  ;;  %v568_v62 = vmax.f32 %v560_v55, 0.0 }
 0x17c   : > { %v563_v57 = vmax.f32 %v555_v52, 0.0  ;;  %v567_v60 = vmax.f32 %v559_v53, 0.0 }
 0x17d   : > { %v583_v61 = vrot.slane %v564_v54, 5  ;;  %v595_v5 = vrot.slane %v568_v62, 1 }
 0x17e   : > { %v580_v59 = vrot.slane %v563_v57, 6  ;;  %v592_v3 = vrot.slane %v567_v60, 2 }
 0x180   : > { %v582_v0 = vsel %vm581_vm1, %v580_v59, %v579_v44 }
 0x181   : > { %v585_v2 = vsel %vm584_vm2, %v583_v61, %v582_v0 }
 0x182   : > { %v588_v4 = vsel %vm587_vm3, %v586_v63, %v585_v2 }
 0x183   : > { %v591_v6 = vsel %vm590_vm4, %v589_v1, %v588_v4 }
 0x184   : > { %v594_v7 = vsel %vm593_vm5, %v592_v3, %v591_v6 }
 0x185   : > { %v597_v8 = vsel %vm596_vm6, %v595_v5, %v594_v7 }
 0x186   : > { %599 = vst [vmem:[%s244_s6] sm:$0xff] %v597_v8 }
 0x187   : > { %988 = shalt.err (!%p985_p1)
}
 0x188   : > { %s989_s10 = scalar_lea.hbm %s1288_s30, 128  ;;  %s993_s28 = scalar_lea.hbm %s1336_s4, 256 }
 0x189   : > { %p990_p13 = scmp.ne.s32.totalorder %s1288_s30, %s989_s10  ;;  %p994_p4 = scmp.lt.u32.totalorder %s1288_s30, %s1336_s4 }
 0x18a   : > { %p995_p7 = scmp.lt.u32.totalorder %s993_s28, %s989_s10  ;;  %p997_p11 = scmp.lt.u32.totalorder %s989_s10, %s1288_s30 }
 0x18b   : > { %p991_p6 = pnand %p990_p13, %p1350_p0 }
 0x18c   : > { %p996_p8 = por %p995_p7, %p994_p4 }
 0x18d   : > { %p992_p10 = pneg %p991_p6 }
 0x18e   : > { %p998_p2 = por %p997_p11, %p996_p8 }
 0x190   : > { %p999_p3 = pnand %p998_p2, %p992_p10 }
 0x192   : > { %1002 = shalt.err (!%p999_p3)
}
 0x193   : > { %812 = dma.vmem_to_hbm [thread:$0]  (%p1350_p0), %s1290_s7, 128, %s1288_s30, %s601_s19  }
 0x194 PF: > { %s626_s11 = sand.u32 1, %s1033_s15   ;;  %p1351_p5 = scmp.ne.s32.totalorder %s1341_s22, 0 }
 0x195   : > { %p1352_p9 = scmp.ge.s32.totalorder %s1045_s18, 2  ;;  %s627_s12 = scalar_lea.sflag [#allocation4], %s626_s11 }
 0x197   : > { %p826_p12 = pnand %p1352_p9, %p1351_p5 }
 0x199   : > { %1028 = dma.done.wait (!%p826_p12), %s627_s12, 128  }
 0x19a   : > { %1030 = vsyncadd (!%p826_p12), %s627_s12, 4294967168  ;;  %p18_p1 = scmp.ge.s32.totalorder %s1193_s13, 4   ;;  %s1353_s15 = smov %s1037_s16 }
 0x19b   : > { %s1354_s16 = smov %s1041_s17  ;;  %s1355_s17 = smov %s1202_s24 }
 0x19c   : > { %s1356_s18 = smov %s1193_s13  ;;  %20 = sbr.rel (!%p18_p1) target bundleno = 6 (0x6), region = 89 }
 0x1a3   :  { %632 = vsyncpa [#allocation3], 1 }
 0x1a4   :  { %634 = vsyncpa [#allocation3 + $0x1], 1 }
 0x1a5   :  { %635 = vsyncpa [#allocation6], 1 }
 0x1a6   :  { %636 = vsyncpa [#allocation4], 1 }
 0x1a7   :  { %638 = vsyncpa [#allocation4 + $0x1], 1 }

</bundles_post_ra>
